<compile_context>
chip_gen: v6e
topology: v6e:2x2x1
jax: 0.10.0
libtpu: 0.0.40
codegen_flags: <defaults>
</compile_context>

<pallas_src>
from dataclasses import dataclass
from typing import Literal

import numpy as np
import jax
import jax.numpy as jnp
from jax import lax
from jax.experimental import pallas as pl
from jax.experimental.pallas import tpu as pltpu

_LANES = 128                       # lane width of a vreg
_SUB = 8                           # sublanes per inner compute chunk (1 f32 vreg)
_MIN_BLOCK_RAYS = _SUB * _LANES    # 1024 rays  (smallest legal block)
_MAX_BLOCK_RAYS = 64 * _LANES      # 8192 rays  (~720 KiB of in+out per step)


@dataclass(frozen=True)
class RayGeneratorConfig:
    override_near_far_from_sphere: bool = True
    cam_opt_mode: Literal["off", "SO3xR3", "SE3"] = "off"
    pl_opt: bool = False
    opt_lr: float = 3e-05
    cam_position_noise_std: float = 0.0
    cam_orientation_noise_std: float = 0.0
    pl_position_noise_std: float = 0.0


@dataclass(frozen=True)
class PinholeCamera:
    fx: float
    fy: float
    cx: float
    cy: float
    zn: float = 0.1
    zf: float = 100.0


def _choose_block_rays(n: int) -> int:
    """Power-of-two multiple of 1024 rays, capped at _MAX_BLOCK_RAYS."""
    blk = _MIN_BLOCK_RAYS
    while blk < n and blk < _MAX_BLOCK_RAYS:
        blk *= 2
    return blk


def _make_ray_kernel(cx, cy, fx, fy, zn, zf, override_near_far, ts):
    cx = float(cx)
    cy = float(cy)
    inv_fx = 1.0 / float(fx)      # trace-time reciprocals: no per-ray divides
    inv_fy = 1.0 / float(fy)
    zn = float(zn)
    zf = float(zf)
    chunks = ts // _SUB           # 8-sublane chunks per block

    def kernel(wh_ref, pose_ref, out_ref):
        # wh_ref: [2, ts, 128], pose_ref: [12, ts, 128], out_ref: [8, ts, 128]

        def compute(s):
            start = s * _SUB
            if not isinstance(start, int):
                start = pl.multiple_of(start, _SUB)
            sl = pl.ds(start, _SUB)

            x = wh_ref[0, sl, :] + 0.5          # [8, 128] full vreg tiles
            y = wh_ref[1, sl, :] + 0.5
            d0 = (x - cx) * inv_fx
            d1 = (cy - y) * inv_fy
            # d2 = -1 (folded into the matvec below)

            r00 = pose_ref[0, sl, :]
            r01 = pose_ref[1, sl, :]
            r02 = pose_ref[2, sl, :]
            t0 = pose_ref[3, sl, :]
            r10 = pose_ref[4, sl, :]
            r11 = pose_ref[5, sl, :]
            r12 = pose_ref[6, sl, :]
            t1 = pose_ref[7, sl, :]
            r20 = pose_ref[8, sl, :]
            r21 = pose_ref[9, sl, :]
            r22 = pose_ref[10, sl, :]
            t2 = pose_ref[11, sl, :]

            # rays_d[i] = sum_j dirs[j] * R[i, j]   with dirs = (d0, d1, -1)
            rd0 = r00 * d0 + r01 * d1 - r02
            rd1 = r10 * d0 + r11 * d1 - r12
            rd2 = r20 * d0 + r21 * d1 - r22

            # F.normalize(rays_d, dim=-1, eps=1e-12) via rsqrt (EUP slot).
            sq = rd0 * rd0 + rd1 * rd1 + rd2 * rd2
            inv = lax.rsqrt(jnp.maximum(sq, 1e-24))
            rd0 = rd0 * inv
            rd1 = rd1 * inv
            rd2 = rd2 * inv

            # Unmasked full-tile stores, one per output channel.
            out_ref[0, sl, :] = t0
            out_ref[1, sl, :] = t1
            out_ref[2, sl, :] = t2
            out_ref[3, sl, :] = rd0
            out_ref[4, sl, :] = rd1
            out_ref[5, sl, :] = rd2

            if override_near_far:
                a = rd0 * rd0 + rd1 * rd1 + rd2 * rd2
                half_b = t0 * rd0 + t1 * rd1 + t2 * rd2      # b / 2
                # mid = 0.5 * -b / a ; clamp keeps padded lanes NaN-free.
                mid = -half_b / jnp.maximum(a, 1e-24)
                out_ref[6, sl, :] = mid - 1.0
                out_ref[7, sl, :] = mid + 1.0
            else:
                ones = jnp.ones_like(t0)
                out_ref[6, sl, :] = zn * ones
                out_ref[7, sl, :] = zf * ones

        if chunks == 1:
            compute(0)
        else:
            def body(s, carry):
                compute(s)
                return carry
            # chunks is a power of two (2/4/8) so unroll=2 has no remainder.
            lax.fori_loop(0, chunks, body, 0, unroll=2)

    return kernel


class RayGenerator:
    """JAX/Pallas port of RayGenerator (default config hot path)."""

    def __init__(self, camera: PinholeCamera, num_cameras: int,
                 config: RayGeneratorConfig):
        self.camera = camera
        self.config = config
        if config.cam_opt_mode == "off":
            pass
        elif config.cam_opt_mode in ("SO3xR3", "SE3"):
            self.cam_pose_adjustment = jnp.zeros((num_cameras, 6), jnp.float32)
            # TODO(synk): exp_map_SO3xR3 / exp_map_SE3 pose refinement is not
            # applied inside the kernel (default config uses cam_opt_mode='off').
        else:
            raise ValueError(
                f"Unknown camera pose optimization mode: {config.cam_opt_mode}")
        if config.pl_opt:
            self.pl_adjustment = jnp.zeros((num_cameras, 3), jnp.float32)
        # TODO(synk): cam_pose_noise / pl_noise buffers not implemented
        # (default noise std == 0.0 so they are never created).

    def __call__(self, w_indices, h_indices, poses, img_indices=None):
        """
        w_indices, h_indices : [N, 1] float
        poses                : [N, 3(+), 4] per-ray camera-to-world poses
        returns (origins [N,3], directions [N,3], nears [N,1], fars [N,1])
        """
        N = w_indices.shape[0]
        block_rays = _choose_block_rays(N)
        ts = block_rays // _LANES                     # sublane rows per block
        Np = ((N + block_rays - 1) // block_rays) * block_rays
        M = Np // _LANES

        # TODO(synk): these channel-major repacks + the output transpose are
        # extra HBM passes; a channel-major [C, N] layout end-to-end (producer
        # and consumer) would remove them entirely.
        wh = jnp.stack(
            [w_indices[..., 0], h_indices[..., 0]], axis=0
        ).astype(jnp.float32)                         # [2, N]
        pose_flat = jnp.transpose(
            poses[:, :3, :4].reshape(N, 12)
        ).astype(jnp.float32)                         # [12, N]

        if Np != N:
            wh = jnp.pad(wh, ((0, 0), (0, Np - N)))
            pose_flat = jnp.pad(pose_flat, ((0, 0), (0, Np - N)))

        wh = wh.reshape(2, M, _LANES)
        pose_flat = pose_flat.reshape(12, M, _LANES)

        kernel = _make_ray_kernel(
            self.camera.cx, self.camera.cy, self.camera.fx, self.camera.fy,
            self.camera.zn, self.camera.zf,
            self.config.override_near_far_from_sphere, ts,
        )

        out = pl.pallas_call(
            kernel,
            out_shape=jax.ShapeDtypeStruct((8, M, _LANES), jnp.float32),
            grid_spec=pltpu.PrefetchScalarGridSpec(
                num_scalar_prefetch=0,
                grid=(M // ts,),
                in_specs=[
                    pl.BlockSpec((2, ts, _LANES), lambda i: (0, i, 0)),
                    pl.BlockSpec((12, ts, _LANES), lambda i: (0, i, 0)),
                ],
                out_specs=pl.BlockSpec((8, ts, _LANES), lambda i: (0, i, 0)),
            ),
            compiler_params=pltpu.CompilerParams(
                dimension_semantics=("parallel",)
            ),
        )(wh, pose_flat)

        out = jnp.transpose(out.reshape(8, Np)[:, :N])   # [N, 8] single transpose
        origins = out[:, 0:3]
        directions = out[:, 3:6]
        nears = out[:, 6:7]
        fars = out[:, 7:8]
        return origins, directions, nears, fars


def _reference(camera, config, w_indices, h_indices, poses):
    """Pure-JAX mirror of the PyTorch forward (default config)."""
    x = w_indices[..., 0] + 0.5
    y = h_indices[..., 0] + 0.5
    dirs = jnp.stack(
        [(x - camera.cx) / camera.fx,
         -(y - camera.cy) / camera.fy,
         -jnp.ones_like(x)], axis=-1)
    R = poses[:, :3, :3]
    t = poses[:, :3, 3:]
    rays_d = jnp.sum(dirs[..., None, :] * R, axis=-1)
    n = jnp.linalg.norm(rays_d, axis=-1, keepdims=True)
    rays_d = rays_d / jnp.maximum(n, 1e-12)
    rays_o = t[..., 0]
    if config.override_near_far_from_sphere:
        a = jnp.sum(rays_d ** 2, axis=-1, keepdims=True)
        b = 2.0 * jnp.sum(rays_o * rays_d, axis=-1, keepdims=True)
        mid = 0.5 * -b / a
        near, far = mid - 1.0, mid + 1.0
    else:
        near = camera.zn * jnp.ones_like(rays_o[..., :1])
        far = camera.zf * jnp.ones_like(rays_o[..., :1])
    return rays_o, rays_d, near, far


if __name__ == "__main__":
    key = jax.random.PRNGKey(0)
    N = 300          # number of rays (exercises lane padding)
    H = W = 64       # image size
    num_cameras = 4

    camera = PinholeCamera(fx=80.0, fy=80.0, cx=W / 2.0, cy=H / 2.0)

    k1, k2, k3 = jax.random.split(key, 3)
    w_idx = jax.random.uniform(k1, (N, 1), jnp.float32, 0.0, float(W - 1))
    h_idx = jax.random.uniform(k2, (N, 1), jnp.float32, 0.0, float(H - 1))
    poses = jax.random.normal(k3, (N, 3, 4), jnp.float32)

    # Default config (override_near_far_from_sphere=True).
    config = RayGeneratorConfig()
    ray_gen = RayGenerator(camera, num_cameras, config)
    origins, directions, nears, fars = ray_gen(w_idx, h_idx, poses)
    jax.block_until_ready((origins, directions, nears, fars))

    ro, rd, nr, fr = _reference(camera, config, w_idx, h_idx, poses)
    np.testing.assert_allclose(np.asarray(origins), np.asarray(ro), rtol=1e-5, atol=1e-5)
    np.testing.assert_allclose(np.asarray(directions), np.asarray(rd), rtol=1e-5, atol=1e-5)
    np.testing.assert_allclose(np.asarray(nears), np.asarray(nr), rtol=1e-5, atol=1e-5)
    np.testing.assert_allclose(np.asarray(fars), np.asarray(fr), rtol=1e-5, atol=1e-5)

    # Fixed near/far branch.
    config2 = RayGeneratorConfig(override_near_far_from_sphere=False)
    ray_gen2 = RayGenerator(camera, num_cameras, config2)
    o2, d2, n2, f2 = ray_gen2(w_idx, h_idx, poses)
    jax.block_until_ready((o2, d2, n2, f2))
    ro2, rd2, nr2, fr2 = _reference(camera, config2, w_idx, h_idx, poses)
    np.testing.assert_allclose(np.asarray(o2), np.asarray(ro2), rtol=1e-5, atol=1e-5)
    np.testing.assert_allclose(np.asarray(d2), np.asarray(rd2), rtol=1e-5, atol=1e-5)
    np.testing.assert_allclose(np.asarray(n2), np.asarray(nr2), rtol=1e-5, atol=1e-5)
    np.testing.assert_allclose(np.asarray(f2), np.asarray(fr2), rtol=1e-5, atol=1e-5)

    print("KERNEL_OK")
</pallas_src>

<mosaic_0001>
module attributes {stable_mosaic.version = 11 : i64} {
  func.func @kernel(%arg0: i32, %arg1: memref<2x8x128xf32, #tpu.memory_space<vmem>>, %arg2: memref<12x8x128xf32, #tpu.memory_space<vmem>>, %arg3: memref<8x8x128xf32, #tpu.memory_space<vmem>>) attributes {dimension_semantics = [#tpu.dimension_semantics<parallel>], iteration_bounds = array<i64: 1>, scalar_prefetch = 0 : i64, scratch_operands = 0 : i64, tpu.core_type = #tpu.core_type<tc>, window_params = [{transform_indices = @transform_0, window_bounds = array<i64: 2, 8, 128>}, {transform_indices = @transform_1, window_bounds = array<i64: 12, 8, 128>}, {transform_indices = @transform_2, window_bounds = array<i64: 8, 8, 128>}]} {
    %c0 = arith.constant 0 : index
    %c0_0 = arith.constant 0 : index
    %c0_1 = arith.constant 0 : index
    %0 = vector.load %arg1[%c0, %c0_0, %c0_1] : memref<2x8x128xf32, #tpu.memory_space<vmem>>, vector<1x8x128xf32>
    %1 = vector.shape_cast %0 : vector<1x8x128xf32> to vector<8x128xf32>
    %cst = arith.constant 5.000000e-01 : f32
    %2 = vector.broadcast %cst : f32 to vector<8x128xf32>
    %3 = arith.addf %1, %2 : vector<8x128xf32>
    %c1 = arith.constant 1 : index
    %c0_2 = arith.constant 0 : index
    %c0_3 = arith.constant 0 : index
    %4 = vector.load %arg1[%c1, %c0_2, %c0_3] : memref<2x8x128xf32, #tpu.memory_space<vmem>>, vector<1x8x128xf32>
    %5 = vector.shape_cast %4 : vector<1x8x128xf32> to vector<8x128xf32>
    %cst_4 = arith.constant 5.000000e-01 : f32
    %6 = vector.broadcast %cst_4 : f32 to vector<8x128xf32>
    %7 = arith.addf %5, %6 : vector<8x128xf32>
    %cst_5 = arith.constant 3.200000e+01 : f32
    %8 = vector.broadcast %cst_5 : f32 to vector<8x128xf32>
    %9 = arith.subf %3, %8 : vector<8x128xf32>
    %cst_6 = arith.constant 1.250000e-02 : f32
    %10 = vector.broadcast %cst_6 : f32 to vector<8x128xf32>
    %11 = arith.mulf %9, %10 : vector<8x128xf32>
    %cst_7 = arith.constant 3.200000e+01 : f32
    %12 = vector.broadcast %cst_7 : f32 to vector<8x128xf32>
    %13 = arith.subf %12, %7 : vector<8x128xf32>
    %cst_8 = arith.constant 1.250000e-02 : f32
    %14 = vector.broadcast %cst_8 : f32 to vector<8x128xf32>
    %15 = arith.mulf %13, %14 : vector<8x128xf32>
    %c0_9 = arith.constant 0 : index
    %c0_10 = arith.constant 0 : index
    %c0_11 = arith.constant 0 : index
    %16 = vector.load %arg2[%c0_9, %c0_10, %c0_11] : memref<12x8x128xf32, #tpu.memory_space<vmem>>, vector<1x8x128xf32>
    %17 = vector.shape_cast %16 : vector<1x8x128xf32> to vector<8x128xf32>
    %c1_12 = arith.constant 1 : index
    %c0_13 = arith.constant 0 : index
    %c0_14 = arith.constant 0 : index
    %18 = vector.load %arg2[%c1_12, %c0_13, %c0_14] : memref<12x8x128xf32, #tpu.memory_space<vmem>>, vector<1x8x128xf32>
    %19 = vector.shape_cast %18 : vector<1x8x128xf32> to vector<8x128xf32>
    %c2 = arith.constant 2 : index
    %c0_15 = arith.constant 0 : index
    %c0_16 = arith.constant 0 : index
    %20 = vector.load %arg2[%c2, %c0_15, %c0_16] : memref<12x8x128xf32, #tpu.memory_space<vmem>>, vector<1x8x128xf32>
    %21 = vector.shape_cast %20 : vector<1x8x128xf32> to vector<8x128xf32>
    %c3 = arith.constant 3 : index
    %c0_17 = arith.constant 0 : index
    %c0_18 = arith.constant 0 : index
    %22 = vector.load %arg2[%c3, %c0_17, %c0_18] : memref<12x8x128xf32, #tpu.memory_space<vmem>>, vector<1x8x128xf32>
    %23 = vector.shape_cast %22 : vector<1x8x128xf32> to vector<8x128xf32>
    %c4 = arith.constant 4 : index
    %c0_19 = arith.constant 0 : index
    %c0_20 = arith.constant 0 : index
    %24 = vector.load %arg2[%c4, %c0_19, %c0_20] : memref<12x8x128xf32, #tpu.memory_space<vmem>>, vector<1x8x128xf32>
    %25 = vector.shape_cast %24 : vector<1x8x128xf32> to vector<8x128xf32>
    %c5 = arith.constant 5 : index
    %c0_21 = arith.constant 0 : index
    %c0_22 = arith.constant 0 : index
    %26 = vector.load %arg2[%c5, %c0_21, %c0_22] : memref<12x8x128xf32, #tpu.memory_space<vmem>>, vector<1x8x128xf32>
    %27 = vector.shape_cast %26 : vector<1x8x128xf32> to vector<8x128xf32>
    %c6 = arith.constant 6 : index
    %c0_23 = arith.constant 0 : index
    %c0_24 = arith.constant 0 : index
    %28 = vector.load %arg2[%c6, %c0_23, %c0_24] : memref<12x8x128xf32, #tpu.memory_space<vmem>>, vector<1x8x128xf32>
    %29 = vector.shape_cast %28 : vector<1x8x128xf32> to vector<8x128xf32>
    %c7 = arith.constant 7 : index
    %c0_25 = arith.constant 0 : index
    %c0_26 = arith.constant 0 : index
    %30 = vector.load %arg2[%c7, %c0_25, %c0_26] : memref<12x8x128xf32, #tpu.memory_space<vmem>>, vector<1x8x128xf32>
    %31 = vector.shape_cast %30 : vector<1x8x128xf32> to vector<8x128xf32>
    %c8 = arith.constant 8 : index
    %c0_27 = arith.constant 0 : index
    %c0_28 = arith.constant 0 : index
    %32 = vector.load %arg2[%c8, %c0_27, %c0_28] : memref<12x8x128xf32, #tpu.memory_space<vmem>>, vector<1x8x128xf32>
    %33 = vector.shape_cast %32 : vector<1x8x128xf32> to vector<8x128xf32>
    %c9 = arith.constant 9 : index
    %c0_29 = arith.constant 0 : index
    %c0_30 = arith.constant 0 : index
    %34 = vector.load %arg2[%c9, %c0_29, %c0_30] : memref<12x8x128xf32, #tpu.memory_space<vmem>>, vector<1x8x128xf32>
    %35 = vector.shape_cast %34 : vector<1x8x128xf32> to vector<8x128xf32>
    %c10 = arith.constant 10 : index
    %c0_31 = arith.constant 0 : index
    %c0_32 = arith.constant 0 : index
    %36 = vector.load %arg2[%c10, %c0_31, %c0_32] : memref<12x8x128xf32, #tpu.memory_space<vmem>>, vector<1x8x128xf32>
    %37 = vector.shape_cast %36 : vector<1x8x128xf32> to vector<8x128xf32>
    %c11 = arith.constant 11 : index
    %c0_33 = arith.constant 0 : index
    %c0_34 = arith.constant 0 : index
    %38 = vector.load %arg2[%c11, %c0_33, %c0_34] : memref<12x8x128xf32, #tpu.memory_space<vmem>>, vector<1x8x128xf32>
    %39 = vector.shape_cast %38 : vector<1x8x128xf32> to vector<8x128xf32>
    %40 = arith.mulf %17, %11 : vector<8x128xf32>
    %41 = arith.mulf %19, %15 : vector<8x128xf32>
    %42 = arith.addf %40, %41 : vector<8x128xf32>
    %43 = arith.subf %42, %21 : vector<8x128xf32>
    %44 = arith.mulf %25, %11 : vector<8x128xf32>
    %45 = arith.mulf %27, %15 : vector<8x128xf32>
    %46 = arith.addf %44, %45 : vector<8x128xf32>
    %47 = arith.subf %46, %29 : vector<8x128xf32>
    %48 = arith.mulf %33, %11 : vector<8x128xf32>
    %49 = arith.mulf %35, %15 : vector<8x128xf32>
    %50 = arith.addf %48, %49 : vector<8x128xf32>
    %51 = arith.subf %50, %37 : vector<8x128xf32>
    %52 = arith.mulf %43, %43 : vector<8x128xf32>
    %53 = arith.mulf %47, %47 : vector<8x128xf32>
    %54 = arith.addf %52, %53 : vector<8x128xf32>
    %55 = arith.mulf %51, %51 : vector<8x128xf32>
    %56 = arith.addf %54, %55 : vector<8x128xf32>
    %cst_35 = arith.constant 1.000000e-24 : f32
    %57 = vector.broadcast %cst_35 : f32 to vector<8x128xf32>
    %58 = arith.maximumf %56, %57 : vector<8x128xf32>
    %59 = math.rsqrt %58 : vector<8x128xf32>
    %60 = arith.mulf %43, %59 : vector<8x128xf32>
    %61 = arith.mulf %47, %59 : vector<8x128xf32>
    %62 = arith.mulf %51, %59 : vector<8x128xf32>
    %c0_36 = arith.constant 0 : index
    %c0_37 = arith.constant 0 : index
    %c0_38 = arith.constant 0 : index
    %63 = vector.load %arg3[%c0_36, %c0_37, %c0_38] : memref<8x8x128xf32, #tpu.memory_space<vmem>>, vector<1x8x128xf32>
    %64 = vector.shape_cast %63 : vector<1x8x128xf32> to vector<8x128xf32>
    %65 = vector.shape_cast %23 : vector<8x128xf32> to vector<1x8x128xf32>
    tpu.vector_store %arg3[%c0_36, %c0_37, %c0_38], %65 {strides = array<i32>} : memref<8x8x128xf32, #tpu.memory_space<vmem>>, vector<1x8x128xf32>,
    %c1_39 = arith.constant 1 : index
    %c0_40 = arith.constant 0 : index
    %c0_41 = arith.constant 0 : index
    %66 = vector.load %arg3[%c1_39, %c0_40, %c0_41] : memref<8x8x128xf32, #tpu.memory_space<vmem>>, vector<1x8x128xf32>
    %67 = vector.shape_cast %66 : vector<1x8x128xf32> to vector<8x128xf32>
    %68 = vector.shape_cast %31 : vector<8x128xf32> to vector<1x8x128xf32>
    tpu.vector_store %arg3[%c1_39, %c0_40, %c0_41], %68 {strides = array<i32>} : memref<8x8x128xf32, #tpu.memory_space<vmem>>, vector<1x8x128xf32>,
    %c2_42 = arith.constant 2 : index
    %c0_43 = arith.constant 0 : index
    %c0_44 = arith.constant 0 : index
    %69 = vector.load %arg3[%c2_42, %c0_43, %c0_44] : memref<8x8x128xf32, #tpu.memory_space<vmem>>, vector<1x8x128xf32>
    %70 = vector.shape_cast %69 : vector<1x8x128xf32> to vector<8x128xf32>
    %71 = vector.shape_cast %39 : vector<8x128xf32> to vector<1x8x128xf32>
    tpu.vector_store %arg3[%c2_42, %c0_43, %c0_44], %71 {strides = array<i32>} : memref<8x8x128xf32, #tpu.memory_space<vmem>>, vector<1x8x128xf32>,
    %c3_45 = arith.constant 3 : index
    %c0_46 = arith.constant 0 : index
    %c0_47 = arith.constant 0 : index
    %72 = vector.load %arg3[%c3_45, %c0_46, %c0_47] : memref<8x8x128xf32, #tpu.memory_space<vmem>>, vector<1x8x128xf32>
    %73 = vector.shape_cast %72 : vector<1x8x128xf32> to vector<8x128xf32>
    %74 = vector.shape_cast %60 : vector<8x128xf32> to vector<1x8x128xf32>
    tpu.vector_store %arg3[%c3_45, %c0_46, %c0_47], %74 {strides = array<i32>} : memref<8x8x128xf32, #tpu.memory_space<vmem>>, vector<1x8x128xf32>,
    %c4_48 = arith.constant 4 : index
    %c0_49 = arith.constant 0 : index
    %c0_50 = arith.constant 0 : index
    %75 = vector.load %arg3[%c4_48, %c0_49, %c0_50] : memref<8x8x128xf32, #tpu.memory_space<vmem>>, vector<1x8x128xf32>
    %76 = vector.shape_cast %75 : vector<1x8x128xf32> to vector<8x128xf32>
    %77 = vector.shape_cast %61 : vector<8x128xf32> to vector<1x8x128xf32>
    tpu.vector_store %arg3[%c4_48, %c0_49, %c0_50], %77 {strides = array<i32>} : memref<8x8x128xf32, #tpu.memory_space<vmem>>, vector<1x8x128xf32>,
    %c5_51 = arith.constant 5 : index
    %c0_52 = arith.constant 0 : index
    %c0_53 = arith.constant 0 : index
    %78 = vector.load %arg3[%c5_51, %c0_52, %c0_53] : memref<8x8x128xf32, #tpu.memory_space<vmem>>, vector<1x8x128xf32>
    %79 = vector.shape_cast %78 : vector<1x8x128xf32> to vector<8x128xf32>
    %80 = vector.shape_cast %62 : vector<8x128xf32> to vector<1x8x128xf32>
    tpu.vector_store %arg3[%c5_51, %c0_52, %c0_53], %80 {strides = array<i32>} : memref<8x8x128xf32, #tpu.memory_space<vmem>>, vector<1x8x128xf32>,
    %81 = arith.mulf %60, %60 : vector<8x128xf32>
    %82 = arith.mulf %61, %61 : vector<8x128xf32>
    %83 = arith.addf %81, %82 : vector<8x128xf32>
    %84 = arith.mulf %62, %62 : vector<8x128xf32>
    %85 = arith.addf %83, %84 : vector<8x128xf32>
    %86 = arith.mulf %23, %60 : vector<8x128xf32>
    %87 = arith.mulf %31, %61 : vector<8x128xf32>
    %88 = arith.addf %86, %87 : vector<8x128xf32>
    %89 = arith.mulf %39, %62 : vector<8x128xf32>
    %90 = arith.addf %88, %89 : vector<8x128xf32>
    %cst_54 = arith.constant 0.000000e+00 : f32
    %91 = vector.broadcast %cst_54 : f32 to vector<8x128xf32>
    %92 = arith.subf %91, %90 : vector<8x128xf32>
    %cst_55 = arith.constant 1.000000e-24 : f32
    %93 = vector.broadcast %cst_55 : f32 to vector<8x128xf32>
    %94 = arith.maximumf %85, %93 : vector<8x128xf32>
    %95 = arith.divf %92, %94 : vector<8x128xf32>
    %cst_56 = arith.constant 1.000000e+00 : f32
    %96 = vector.broadcast %cst_56 : f32 to vector<8x128xf32>
    %97 = arith.subf %95, %96 : vector<8x128xf32>
    %c6_57 = arith.constant 6 : index
    %c0_58 = arith.constant 0 : index
    %c0_59 = arith.constant 0 : index
    %98 = vector.load %arg3[%c6_57, %c0_58, %c0_59] : memref<8x8x128xf32, #tpu.memory_space<vmem>>, vector<1x8x128xf32>
    %99 = vector.shape_cast %98 : vector<1x8x128xf32> to vector<8x128xf32>
    %100 = vector.shape_cast %97 : vector<8x128xf32> to vector<1x8x128xf32>
    tpu.vector_store %arg3[%c6_57, %c0_58, %c0_59], %100 {strides = array<i32>} : memref<8x8x128xf32, #tpu.memory_space<vmem>>, vector<1x8x128xf32>,
    %cst_60 = arith.constant 1.000000e+00 : f32
    %101 = vector.broadcast %cst_60 : f32 to vector<8x128xf32>
    %102 = arith.addf %95, %101 : vector<8x128xf32>
    %c7_61 = arith.constant 7 : index
    %c0_62 = arith.constant 0 : index
    %c0_63 = arith.constant 0 : index
    %103 = vector.load %arg3[%c7_61, %c0_62, %c0_63] : memref<8x8x128xf32, #tpu.memory_space<vmem>>, vector<1x8x128xf32>
    %104 = vector.shape_cast %103 : vector<1x8x128xf32> to vector<8x128xf32>
    %105 = vector.shape_cast %102 : vector<8x128xf32> to vector<1x8x128xf32>
    tpu.vector_store %arg3[%c7_61, %c0_62, %c0_63], %105 {strides = array<i32>} : memref<8x8x128xf32, #tpu.memory_space<vmem>>, vector<1x8x128xf32>,
    return
  }
  func.func @transform_0(%arg0: i32) -> (i32, i32, i32) {
    %c0_i32 = arith.constant 0 : i32
    %c0_i32_0 = arith.constant 0 : i32
    %c0_i32_1 = arith.constant 0 : i32
    return %c0_i32, %arg0, %c0_i32_0 : i32, i32, i32
  }
  func.func @transform_1(%arg0: i32) -> (i32, i32, i32) {
    %c0_i32 = arith.constant 0 : i32
    %c0_i32_0 = arith.constant 0 : i32
    %c0_i32_1 = arith.constant 0 : i32
    return %c0_i32, %arg0, %c0_i32_0 : i32, i32, i32
  }
  func.func @transform_2(%arg0: i32) -> (i32, i32, i32) {
    %c0_i32 = arith.constant 0 : i32
    %c0_i32_0 = arith.constant 0 : i32
    %c0_i32_1 = arith.constant 0 : i32
    return %c0_i32, %arg0, %c0_i32_0 : i32, i32, i32
  }
}

</mosaic_0001>

<bundles_post_ra>
// kernel: tpu_custom_call.1
= control target key start
LH: loop header
LB: loop body
LE: loop exit
PB: predicated region body
PF: predicated region fallthrough
CT: control target
= control target key end

     0   :  { %7 = vsyncpa [#allocation3], 0  ;;  %s258_s0 = inlined_call_operand.hbm [shape: f32[2,8,128], index: 0, kind: input, shape index: {}]   ;;  %s259_s1 = inlined_call_operand.hbm [shape: f32[12,8,128], index: 1, kind: input, shape index: {}]   ;;  %s260_s2 = inlined_call_operand.hbm [shape: f32[8,8,128], index: 2, kind: output, shape index: {}]  }
   0x1   :  { %8 = vsyncpa [#allocation6], 0 }
   0x2   :  { %9 = vsyncpa [#allocation4], 0  ;;  %s220_s9 = smov [#allocation2]  }
   0x3   :  { %s15_s10 = sshll.u32 %s220_s9, 4  ;;  %s16_s10 = int_to_ptr.vmem [resolvable:$true] %s15_s10 }
   0x4   :  { %s162_s11 = scalar_lea.vmem %s16_s10, 256  ;;  %p167_p1 = scmp.lt.s32.totalorder %s16_s10, %s16_s10 }
   0x5   :  { %p163_p0 = scmp.ne.s32.totalorder %s16_s10, %s162_s11  ;;  %p168_p2 = scmp.lt.s32.totalorder %s162_s11, %s162_s11 }
   0x7   :  { %p169_p3 = por %p168_p2, %p167_p1 }
   0x9   :  { %p170_p4 = pnand %p169_p3, %p163_p0 }
   0xb   :  { %173 = shalt.err (!%p170_p4)
}
   0xc   :  { %s221_s12 = smov 128   ;;  %s222_s13 = smov 8  }
   0xd   :  { %21 = dma.hbm_to_vmem [thread:$0]  %s258_s0, 256, %s16_s10, [#allocation3], %s221_s12, %s221_s12, %s222_s13  }
   0xe   :  { %s223_s16 = smov [#allocation5]  }
   0xf   :  { %s27_s17 = sshll.u32 %s223_s16, 4  ;;  %s28_s17 = int_to_ptr.vmem [resolvable:$true] %s27_s17 }
  0x10   :  { %s182_s18 = scalar_lea.vmem %s28_s17, 1536  ;;  %p187_p6 = scmp.lt.s32.totalorder %s28_s17, %s28_s17 }
  0x11   :  { %p183_p5 = scmp.ne.s32.totalorder %s28_s17, %s182_s18  ;;  %p188_p7 = scmp.lt.s32.totalorder %s182_s18, %s182_s18 }
  0x13   :  { %p189_p8 = por %p188_p7, %p187_p6 }
  0x15   :  { %p190_p9 = pnand %p189_p8, %p183_p5 }
  0x17   :  { %193 = shalt.err (!%p190_p9)
}
  0x18   :  { %33 = dma.hbm_to_vmem [thread:$0]  %s259_s1, 1536, %s28_s17, [#allocation6], %s221_s12, %s221_s12, %s222_s13  }
  0x19   :  { %214 = dma.done.wait [#allocation3], 256  }
  0x1a   :  { %215 = vsyncadd [#allocation3], 4294967040 }
  0x1b   :  { %216 = dma.done.wait [#allocation6], 1536  }
  0x1c   :  { %217 = vsyncadd [#allocation6], 4294965760  ;;  %v40_v0 = vld [vmem:[#allocation2] sm:$0xff]  ;;  %v43_v1 = vld [vmem:[#allocation2 + $0x8] sm:$0xff]  ;;  %s224_s0 = smov [#allocation7]  }
  0x1d   :  { %v41_v2 = vadd.f32 0.5, %v40_v0  ;;  %v44_v3 = vadd.f32 0.5, %v43_v1  ;;  %v55_v4 = vld [vmem:[#allocation5 + $0x18] sm:$0xff]  ;;  %v49_v7 = vld [vmem:[#allocation5] sm:$0xff]  ;;  %v51_v8 = vld [vmem:[#allocation5 + $0x8] sm:$0xff]  ;;  %s130_s1 = sshll.u32 %s224_s0, 4  ;;  %s131_s1 = int_to_ptr.vmem [resolvable:$true] %s130_s1 }
  0x1e   :  { %94 = vst [vmem:[#allocation7] sm:$0xff] %v55_v4  ;;  %v57_v9 = vld [vmem:[#allocation5 + $0x20] sm:$0xff]  ;;  %v59_v10 = vld [vmem:[#allocation5 + $0x28] sm:$0xff]  ;;  %v63_v11 = vld [vmem:[#allocation5 + $0x38] sm:$0xff]  ;;  %s194_s21 = scalar_lea.vmem %s131_s1, 1024  ;;  %p199_p11 = scmp.lt.s32.totalorder %s131_s1, %s131_s1 }
  0x1f   :  { %v143_v5 = vadd.f32 -32.0, %v41_v2  ;;  %v47_v6 = vsub.f32 32.0, %v44_v3  ;;  %v71_v12 = vld [vmem:[#allocation5 + $0x58] sm:$0xff]  ;;  %v65_v15 = vld [vmem:[#allocation5 + $0x40] sm:$0xff]  ;;  %v67_v16 = vld [vmem:[#allocation5 + $0x48] sm:$0xff]  ;;  %96 = vst [vmem:[#allocation7 + $0x8] sm:$0xff] %v63_v11  ;;  %p195_p10 = scmp.ne.s32.totalorder %s131_s1, %s194_s21  ;;  %p200_p12 = scmp.lt.s32.totalorder %s194_s21, %s194_s21 }
  0x20   :  { %98 = vst [vmem:[#allocation7 + $0x10] sm:$0xff] %v71_v12  ;;  %v53_v21 = vld [vmem:[#allocation5 + $0x10] sm:$0xff] }
  0x21   :  { %v46_v13 = vmul.f32 0.0125, %v143_v5  ;;  %v48_v14 = vmul.f32 0.0125, %v47_v6  ;;  %v61_v22 = vld [vmem:[#allocation5 + $0x30] sm:$0xff]  ;;  %p201_p13 = por %p200_p12, %p199_p11 }
  0x22   :  { %v69_v25 = vld [vmem:[#allocation5 + $0x50] sm:$0xff] }
  0x23   :  { %v72_v17 = vmul.f32 %v49_v7, %v46_v13  ;;  %v73_v18 = vmul.f32 %v51_v8, %v48_v14  ;;  %v76_v19 = vmul.f32 %v57_v9, %v46_v13  ;;  %v77_v20 = vmul.f32 %v59_v10, %v48_v14  ;;  %p202_p0 = pnand %p201_p13, %p195_p10 }
  0x24   :  { %v80_v23 = vmul.f32 %v65_v15, %v46_v13  ;;  %v81_v24 = vmul.f32 %v67_v16, %v48_v14 }
  0x25   :  { %v74_v26 = vadd.f32 %v73_v18, %v72_v17  ;;  %v78_v27 = vadd.f32 %v77_v20, %v76_v19 }
  0x26   :  { %v82_v28 = vadd.f32 %v81_v24, %v80_v23 }
  0x27   :  { %v75_v29 = vsub.f32 %v74_v26, %v53_v21  ;;  %v79_v30 = vsub.f32 %v78_v27, %v61_v22 }
  0x28   :  { %v83_v31 = vsub.f32 %v82_v28, %v69_v25 }
  0x29   :  { %v84_v32 = vmul.f32 %v75_v29, %v75_v29  ;;  %v85_v33 = vmul.f32 %v79_v30, %v79_v30 }
  0x2a   :  { %v87_v34 = vmul.f32 %v83_v31, %v83_v31 }
  0x2b   :  { %v86_v35 = vadd.f32 %v85_v33, %v84_v32 }
  0x2d   :  { %v88_v36 = vadd.f32 %v87_v34, %v86_v35 }
  0x2f   :  { %v89_v37 = vmax.f32 %v88_v36, 1e-24 }
  0x31   :  { %150 = vrsqrt.f32 %v89_v37 }
  0x3e   :  { %v151_v38 = vpop.eup %150 }
  0x3f   :  { %v91_v39 = vmul.f32 %v151_v38, %v75_v29  ;;  %v92_v40 = vmul.f32 %v151_v38, %v79_v30  ;;  %v93_v41 = vmul.f32 %v151_v38, %v83_v31 }
  0x41   :  { %v105_v42 = vmul.f32 %v91_v39, %v91_v39  ;;  %100 = vst [vmem:[#allocation7 + $0x18] sm:$0xff] %v91_v39  ;;  %v106_v43 = vmul.f32 %v92_v40, %v92_v40  ;;  %102 = vst [vmem:[#allocation7 + $0x20] sm:$0xff] %v92_v40  ;;  %v108_v44 = vmul.f32 %v93_v41, %v93_v41 }
  0x42   :  { %104 = vst [vmem:[#allocation7 + $0x28] sm:$0xff] %v93_v41  ;;  %v110_v47 = vmul.f32 %v91_v39, %v55_v4  ;;  %v111_v48 = vmul.f32 %v92_v40, %v63_v11  ;;  %v113_v51 = vmul.f32 %v93_v41, %v71_v12 }
  0x43   :  { %v107_v45 = vadd.f32 %v106_v43, %v105_v42 }
  0x44   :  { %v112_v50 = vadd.f32 %v111_v48, %v110_v47 }
  0x45   :  { %v109_v46 = vadd.f32 %v108_v44, %v107_v45 }
  0x46   :  { %v114_v52 = vadd.f32 %v113_v51, %v112_v50 }
  0x47   :  { %v116_v49 = vmax.f32 %v109_v46, 1e-24 }
  0x48   :  { %v115_v53 = vsub.f32 0.0, %v114_v52 }
  0x49   :  { %152 = vrcp.f32 %v116_v49 }
  0x56   :  { %v153_v54 = vpop.eup %152 }
  0x57   :  { %v118_v55 = vmul.f32 %v153_v54, %v115_v53 }
  0x59   :  { %v144_v56 = vadd.f32 -1.0, %v118_v55  ;;  %v122_v57 = vadd.f32 1.0, %v118_v55 }
  0x5b   :  { %121 = vst [vmem:[#allocation7 + $0x30] sm:$0xff] %v144_v56  ;;  %124 = vst [vmem:[#allocation7 + $0x38] sm:$0xff] %v122_v57 }
  0x5c   :  { %205 = shalt.err (!%p202_p0)
}
  0x5d   :  { %136 = dma.vmem_to_hbm [thread:$0]  %s131_s1, 1024, %s260_s2, [#allocation4], %s221_s12, %s221_s12, %s222_s13  }
  0x5e   :  { %218 = dma.done.wait [#allocation4], 1024  }
  0x5f   :  { %219 = vsyncadd [#allocation4], 4294966272 }
  0x60   :  { %140 = vsyncpa [#allocation3], 1 }
  0x61   :  { %141 = vsyncpa [#allocation6], 1 }
  0x62   :  { %142 = vsyncpa [#allocation4], 1 }

</bundles_post_ra>
